<compile_context>
chip_gen: v5e
topology: v5e:2x2
jax: 0.10.0
libtpu: 0.0.40
codegen_flags: <defaults>
</compile_context>

<pallas_src>
import functools

import jax
import jax.numpy as jnp
from jax.experimental import pallas as pl
from jax.experimental.pallas import tpu as pltpu


def _round_up(v, m):
    return -(-v // m) * m


def _loss_kernel(x_ref, w_ref, lab_ref, msk_ref, out_ref, *, n_rows, row_tile):
    """Fused: logits = [x,1] @ [[W],[b]]; masked NLL via on-the-fly logsumexp; per-tile partial."""
    i = pl.program_id(0)

    # (TM, Ha) bf16 @ (Ha, Cp) bf16 -> (TM, Cp) f32 on the MXU.
    # The bias (and the -1e30 padded-class bias) is folded into the last row of W.
    logits = jnp.dot(x_ref[...], w_ref[...], preferred_element_type=jnp.float32)

    # Numerically stable logsumexp along the class (lane) axis.
    m = jnp.max(logits, axis=-1, keepdims=True)
    lse = jnp.log(jnp.sum(jnp.exp(logits - m), axis=-1, keepdims=True)) + m   # (TM, 1)

    labels = lab_ref[...]                                                     # (TM, 1) int32
    mask = msk_ref[...]                                                       # (TM, 1) f32

    # gather(dim=2, index=label): one-hot select on the raw logits (no logp materialized).
    cls = jax.lax.broadcasted_iota(jnp.int32, (1, logits.shape[-1]), 1)       # (1, Cp)
    picked = jnp.sum(jnp.where(cls == labels, logits, 0.0),
                     axis=-1, keepdims=True)                                  # (TM, 1)

    # Row-validity select for the (possibly ragged) last tile: x is NOT padded in HBM, so
    # out-of-range rows hold garbage; a select (not a multiply) keeps NaN/Inf out of the sum.
    row = jax.lax.broadcasted_iota(jnp.int32, (row_tile, 1), 0) + i * row_tile
    contrib = jnp.where(row < n_rows, (lse - picked) * mask, 0.0)             # (TM, 1)

    # Independent per-tile partial sum -> the grid axis is safe to run "parallel"
    # (dual-TensorCore on v7x); the final reduce over num_tiles happens outside the kernel.
    out_ref[...] = jnp.broadcast_to(jnp.sum(contrib), (1, 1, 128))


@functools.partial(jax.jit, static_argnames=("row_tile",))
def pallas_masked_nll(x, w_aug, labels, mask2, *, row_tile=512):
    """x: (N, Ha) bf16 (last column == 1), w_aug: (Ha, Cp) bf16 ([[W],[b]] class-padded),
    labels: (N, 1) int32, mask2: (N, 1) f32.  Returns the scalar masked NLL sum.

    row_tile default 512 fits every chip's VMEM budget comfortably; sweep 1024-2048 on
    v5e/v6e for very large N if the x DMA is exposed.
    """
    n, h_aug = x.shape
    c_pad = w_aug.shape[1]

    if n == 0:                      # empty-grid guard (static shape -> Python branch)
        return jnp.float32(0.0)

    # Shrink the tile for tiny inputs (keeps the sublane dim a multiple of 16 for bf16).
    tm = min(row_tile, _round_up(n, 16))
    num_tiles = pl.cdiv(n, tm)

    partials = pl.pallas_call(
        functools.partial(_loss_kernel, n_rows=n, row_tile=tm),
        out_shape=jax.ShapeDtypeStruct((num_tiles, 1, 128), jnp.float32),
        grid=(num_tiles,),
        in_specs=[
            pl.BlockSpec((tm, h_aug), lambda i: (i, 0)),     # x rows (streamed, bf16)
            pl.BlockSpec((h_aug, c_pad), lambda i: (0, 0)),  # [[W],[b]] (grid-invariant)
            pl.BlockSpec((tm, 1), lambda i: (i, 0)),         # labels (int32)
            pl.BlockSpec((tm, 1), lambda i: (i, 0)),         # mask2 (f32)
        ],
        out_specs=pl.BlockSpec((1, 1, 128), lambda i: (i, 0, 0)),   # per-tile partial
        compiler_params=pltpu.CompilerParams(
            dimension_semantics=("parallel",),               # per-tile blocks are independent
            vmem_limit_bytes=48 * 1024 * 1024,               # > v5e 16MiB default, < v7x 64MiB
        ),
    )(x, w_aug, labels, mask2)

    return jnp.sum(partials[:, 0, 0])


def _build_w_aug(w, b):
    """Stack [[W],[b]] and pad the class axis; padded classes get a -1e30 folded bias."""
    h, c = w.shape
    # 128-lane dense; when C is large, round to 256 (full-width MXU on v6e/v7x, and a
    # multiple of 256 is still a multiple of 128 for v5e).
    c_pad = 128 if c <= 128 else _round_up(c, 256)
    w_aug = jnp.zeros((h + 1, c_pad), jnp.float32)
    w_aug = w_aug.at[:h, :c].set(w)
    w_aug = w_aug.at[h, :c].set(b.reshape(-1))
    if c_pad > c:
        # exp(-1e30 - m) == 0 in the logsumexp; labels < C so padded classes are never gathered.
        w_aug = w_aug.at[h, c:].set(-1e30)
    return w_aug.astype(jnp.bfloat16)


def init_params(key, vocab, hidden, num_classes):
    """Deterministic synthetic 'Model' parameters (embedding + classifier)."""
    k1, k2, k3 = jax.random.split(key, 3)
    emb = jax.random.normal(k1, (vocab, hidden), jnp.float32) * 0.1
    w = jax.random.normal(k2, (hidden, num_classes), jnp.float32) * 0.1
    b = jax.random.normal(k3, (1, num_classes), jnp.float32) * 0.1
    # Store the table in bf16 WITH a trailing ones column:
    #   * bf16 storage -> the gathered x stream is already the kernel operand (no cast pass),
    #   * the ones column folds the classifier bias into the matmul.
    emb_aug = jnp.concatenate(
        [emb, jnp.ones((vocab, 1), jnp.float32)], axis=1).astype(jnp.bfloat16)
    return {"emb": emb, "emb_aug": emb_aug, "w": w, "b": b}


def loss_wrapper_forward(params, sent, sen_len, rel, mask, label, mask2,
                         poses=None, chars=None):
    """JAX/Pallas equivalent of LossWrapper.forward.

    Synthetic model: predict = embed(sent) @ W + b (the `weight` output is unused by
    the loss). Matmul, log_softmax, gather and masked-sum all run inside the kernel.
    """
    del sen_len, rel, poses, chars  # glue inputs ignored by the synthetic model
    del mask                        # the loss only uses mask2
    x = params["emb_aug"][sent]                              # (B, T, H+1) bf16 gather
    b_, t_, h_aug = x.shape
    x = x.reshape(b_ * t_, h_aug)
    labels = label.reshape(b_ * t_, 1).astype(jnp.int32)     # int32 stream (exact for any C)
    m2 = mask2.reshape(b_ * t_, 1).astype(jnp.float32)
    w_aug = _build_w_aug(params["w"], params["b"])           # tiny (H+1, c_pad) bf16
    return pallas_masked_nll(x, w_aug, labels, m2)


def reference_forward(params, sent, label, mask2):
    # Mirrors the kernel's compute dtypes (bf16 operands incl. bias, f32 accumulation).
    emb = params["emb"][sent].astype(jnp.bfloat16)
    w = params["w"].astype(jnp.bfloat16)
    b = params["b"].astype(jnp.bfloat16).astype(jnp.float32)
    logits = jnp.einsum("bth,hc->btc", emb, w,
                        preferred_element_type=jnp.float32) + b[0]
    logp = jax.nn.log_softmax(logits, axis=-1)
    gathered = jnp.take_along_axis(logp, label[..., None], axis=2)[..., 0]
    return jnp.sum(-gathered * mask2)


if __name__ == "__main__":
    B, T, VOCAB, H, C = 2, 8, 32, 32, 16

    key = jax.random.PRNGKey(0)
    kp, ks, kl, km = jax.random.split(key, 4)

    params = init_params(kp, VOCAB, H, C)

    sent = jax.random.randint(ks, (B, T), 0, VOCAB, dtype=jnp.int32)
    sen_len = jnp.full((B,), T, dtype=jnp.int32)
    rel = jnp.zeros((B, T), dtype=jnp.int32)
    mask = jnp.ones((B, T), dtype=jnp.float32)
    label = jax.random.randint(kl, (B, T), 0, C, dtype=jnp.int32)
    mask2 = (jax.random.uniform(km, (B, T)) > 0.3).astype(jnp.float32)

    loss = loss_wrapper_forward(params, sent, sen_len, rel, mask, label, mask2)
    loss = jax.block_until_ready(loss)

    ref = reference_forward(params, sent, label, mask2)
    if not jnp.allclose(loss, ref, rtol=1e-3, atol=1e-3):
        raise AssertionError(f"mismatch: pallas={loss} ref={ref}")

    print("KERNEL_OK")
</pallas_src>

<mosaic_0001>
module attributes {stable_mosaic.version = 11 : i64} {
  func.func @_loss_kernel(%arg0: i32, %arg1: memref<16x33xbf16, #tpu.memory_space<vmem>>, %arg2: memref<33x128xbf16, #tpu.memory_space<vmem>>, %arg3: memref<16x1xi32, #tpu.memory_space<vmem>>, %arg4: memref<16x1xf32, #tpu.memory_space<vmem>>, %arg5: memref<1x1x128xf32, #tpu.memory_space<vmem>>) attributes {dimension_semantics = [#tpu.dimension_semantics<parallel>], iteration_bounds = array<i64: 1>, scalar_prefetch = 0 : i64, scratch_operands = 0 : i64, tpu.core_type = #tpu.core_type<tc>, window_params = [{transform_indices = @transform_0, window_bounds = array<i64: 16, 33>}, {pipeline_mode = #tpu.pipeline_mode<synchronous>, transform_indices = @transform_1, window_bounds = array<i64: 33, 128>}, {transform_indices = @transform_2, window_bounds = array<i64: 16, 1>}, {transform_indices = @transform_3, window_bounds = array<i64: 16, 1>}, {transform_indices = @transform_4, window_bounds = array<i64: 1, 1, 128>}]} {
    %c0 = arith.constant 0 : index
    %c0_0 = arith.constant 0 : index
    %0 = vector.load %arg1[%c0, %c0_0] : memref<16x33xbf16, #tpu.memory_space<vmem>>, vector<16x33xbf16>
    %c0_1 = arith.constant 0 : index
    %c0_2 = arith.constant 0 : index
    %1 = vector.load %arg2[%c0_1, %c0_2] : memref<33x128xbf16, #tpu.memory_space<vmem>>, vector<33x128xbf16>
    %cst = arith.constant dense<0.000000e+00> : vector<16x128xf32>
    %2 = tpu.matmul %0, %1, %cst {dimension_numbers = #tpu.dot_dimension_numbers<[1], [0], [0], [1], [0, 0, 1, 1], [], []>} : vector<16x33xbf16>, vector<33x128xbf16>, vector<16x128xf32> -> vector<16x128xf32>
    %cst_3 = arith.constant dense<0xFF800000> : vector<16xf32>
    %3 = vector.multi_reduction <maximumf>, %2, %cst_3 [1] : vector<16x128xf32> to vector<16xf32>
    %4 = vector.shape_cast %3 : vector<16xf32> to vector<16x1xf32>
    %5 = vector.broadcast %4 : vector<16x1xf32> to vector<16x128xf32>
    %6 = arith.subf %2, %5 : vector<16x128xf32>
    %7 = math.exp %6 : vector<16x128xf32>
    %cst_4 = arith.constant dense<0.000000e+00> : vector<16xf32>
    %8 = vector.multi_reduction <add>, %7, %cst_4 [1] : vector<16x128xf32> to vector<16xf32>
    %9 = vector.shape_cast %8 : vector<16xf32> to vector<16x1xf32>
    %10 = math.log %9 : vector<16x1xf32>
    %11 = arith.addf %10, %4 : vector<16x1xf32>
    %c0_5 = arith.constant 0 : index
    %c0_6 = arith.constant 0 : index
    %12 = vector.load %arg3[%c0_5, %c0_6] : memref<16x1xi32, #tpu.memory_space<vmem>>, vector<16x1xi32>
    %c0_7 = arith.constant 0 : index
    %c0_8 = arith.constant 0 : index
    %13 = vector.load %arg4[%c0_7, %c0_8] : memref<16x1xf32, #tpu.memory_space<vmem>>, vector<16x1xf32>
    %14 = tpu.iota {dimensions = array<i32: 1>} : vector<1x128xi32>
    %15 = vector.broadcast %14 : vector<1x128xi32> to vector<16x128xi32>
    %16 = vector.broadcast %12 : vector<16x1xi32> to vector<16x128xi32>
    %17 = arith.cmpi eq, %15, %16 : vector<16x128xi32>
    %cst_9 = arith.constant 0.000000e+00 : f32
    %18 = vector.broadcast %cst_9 : f32 to vector<16x128xf32>
    %19 = arith.select %17, %2, %18 : vector<16x128xi1>, vector<16x128xf32>
    %cst_10 = arith.constant dense<0.000000e+00> : vector<16xf32>
    %20 = vector.multi_reduction <add>, %19, %cst_10 [1] : vector<16x128xf32> to vector<16xf32>
    %21 = vector.shape_cast %20 : vector<16xf32> to vector<16x1xf32>
    %22 = tpu.iota {dimensions = array<i32: 0>} : vector<16x1xi32>
    %c16_i32 = arith.constant 16 : i32
    %23 = arith.muli %arg0, %c16_i32 : i32
    %24 = vector.broadcast %23 : i32 to vector<16x1xi32>
    %25 = arith.addi %22, %24 : vector<16x1xi32>
    %c16_i32_11 = arith.constant 16 : i32
    %26 = vector.broadcast %c16_i32_11 : i32 to vector<16x1xi32>
    %27 = arith.cmpi slt, %25, %26 : vector<16x1xi32>
    %28 = arith.subf %11, %21 : vector<16x1xf32>
    %29 = arith.mulf %28, %13 : vector<16x1xf32>
    %cst_12 = arith.constant 0.000000e+00 : f32
    %30 = vector.broadcast %cst_12 : f32 to vector<16x1xf32>
    %31 = arith.select %27, %29, %30 : vector<16x1xi1>, vector<16x1xf32>
    %32 = vector.shape_cast %31 : vector<16x1xf32> to vector<1x16x1xf32>
    %cst_13 = arith.constant dense<0.000000e+00> : vector<1xf32>
    %33 = vector.multi_reduction <add>, %32, %cst_13 [1, 2] : vector<1x16x1xf32> to vector<1xf32>
    %34 = vector.shape_cast %33 : vector<1xf32> to vector<1x1x1xf32>
    %35 = vector.extract %34[0, 0, 0] : f32 from vector<1x1x1xf32>
    %36 = vector.broadcast %35 : f32 to vector<1x1x128xf32>
    %c0_14 = arith.constant 0 : index
    %c0_15 = arith.constant 0 : index
    %c0_16 = arith.constant 0 : index
    %37 = vector.load %arg5[%c0_14, %c0_15, %c0_16] : memref<1x1x128xf32, #tpu.memory_space<vmem>>, vector<1x1x128xf32>
    tpu.vector_store %arg5[%c0_14, %c0_15, %c0_16], %36 {strides = array<i32>} : memref<1x1x128xf32, #tpu.memory_space<vmem>>, vector<1x1x128xf32>,
    return
  }
  func.func @transform_0(%arg0: i32) -> (i32, i32) {
    %c0_i32 = arith.constant 0 : i32
    %c0_i32_0 = arith.constant 0 : i32
    return %arg0, %c0_i32 : i32, i32
  }
  func.func @transform_1(%arg0: i32) -> (i32, i32) {
    %c0_i32 = arith.constant 0 : i32
    %c0_i32_0 = arith.constant 0 : i32
    %c0_i32_1 = arith.constant 0 : i32
    return %c0_i32, %c0_i32_0 : i32, i32
  }
  func.func @transform_2(%arg0: i32) -> (i32, i32) {
    %c0_i32 = arith.constant 0 : i32
    %c0_i32_0 = arith.constant 0 : i32
    return %arg0, %c0_i32 : i32, i32
  }
  func.func @transform_3(%arg0: i32) -> (i32, i32) {
    %c0_i32 = arith.constant 0 : i32
    %c0_i32_0 = arith.constant 0 : i32
    return %arg0, %c0_i32 : i32, i32
  }
  func.func @transform_4(%arg0: i32) -> (i32, i32, i32) {
    %c0_i32 = arith.constant 0 : i32
    %c0_i32_0 = arith.constant 0 : i32
    %c0_i32_1 = arith.constant 0 : i32
    return %arg0, %c0_i32, %c0_i32_0 : i32, i32, i32
  }
}

</mosaic_0001>

<bundles_post_ra>
// kernel: pallas_masked_nll.1
= control target key start
LH: loop header
LB: loop body
LE: loop exit
PB: predicated region body
PF: predicated region fallthrough
CT: control target
= control target key end

     0   :  { %vm50_vm0 = vcmask 1040384   ;;  %v212_v2 = vmov 0   ;;  %s266_s0 = inlined_call_operand.vmem [shape: bf16[16,33], index: 0, kind: input, shape index: {}]   ;;  %s267_s1 = inlined_call_operand.vmem [shape: bf16[33,128], index: 1, kind: input, shape index: {}]   ;;  %s268_s2 = inlined_call_operand.vmem [shape: s32[16,1], index: 2, kind: input, shape index: {}]   ;;  %s269_s3 = inlined_call_operand.vmem [shape: f32[16,1], index: 3, kind: input, shape index: {}]   ;;  %s270_s4 = inlined_call_operand.hbm [shape: f32[1,1,128], index: 4, kind: output, shape index: {}]  }
   0x1   :  { %v25_v0 = vld [vmem:[%s267_s1 + $0x10] sm:$0x1]  ;;  %176 = vset.pattern.permute.xlu1 %v212_v2  ;;  %v90_v3 = vld [vmem:[%s268_s2] sm:$0xff]  ;;  %177 = vset.pattern.permute.xlu0 %v212_v2  ;;  %v52_v4 = vsel %vm50_vm0, 65535, %v212_v2 }
   0x2   :  { %v40_v1 = vunpack.c.l.b16 %v25_v0  ;;  %97 = vperm.xlu1 %176, %v90_v3  }
   0x3   :  { %9 = vsyncpa [#allocation3], 0  ;;  %v171_v7 = vld [vmem:[%s267_s1 + $0x8] sm:$0xff]  ;;  %v170_v9 = vld [vmem:[%s267_s1] sm:$0xff]  ;;  %vm46_vm1 = vcmask 269312   ;;  %v94_v12 = vlaneseq  ;;  %vm125_vm4 = vcmask 7168  }
   0x4   :  { %v43_v5 = vpack.c.b16 %v40_v1, %v40_v1  ;;  %v91_v8 = vld [vmem:[%s268_s2 + $0x8] sm:$0xff]  ;;  %v169_v10 = vld [vmem:[%s266_s0] sm:$0xff]  ;;  %s213_s28 = smov [#allocation2]   ;;  %s147_s5 = sshll.u32 %s270_s4, 4  ;;  %s148_s5 = int_to_ptr.hbm [resolvable:$true] %s147_s5 }
   0x5   :  { %v95_v15 = vand.u32 127, %v94_v12  ;;  %v92_v36 = vld [vmem:[%s269_s3] sm:$0xff]  ;;  %v93_v39 = vld [vmem:[%s269_s3 + $0x8] sm:$0xff]  ;;  %s145_s29 = sshll.u32 %s213_s28, 4  ;;  %s146_s29 = int_to_ptr.vmem [resolvable:$true] %s145_s29 }
   0x6   :  { %v54_v6 = vand.u32 %v52_v4, %v43_v5 }
   0x8   :  { %61 = vmatpush.bf16.msra.mxu0 %v54_v6 }
   0xa   :  { %100 = vperm.xlu1 %176, %v91_v8  }
   0xc   :  { %62 = vmatpush.bf16.msra.mxu0 %v171_v7 }
  0x10   :  { %63 = vmatpush.bf16.msra.mxu0 %v170_v9 }
  0x13   :  { %168 = vmatmul.msk.bf16.vlgmr.msra.gmra.mxu0 %vm46_vm1, %v169_v10 }
  0x74   :  { %v98_v11 = vpop.permute.xlu1 %97 }
  0x75   :  { %vm102_vm3 = vcmp.eq.s32.totalorder %v95_v15, %v98_v11 }
  0x7c   :  { %v101_v14 = vpop.permute.xlu1 %100 }
  0x7d   :  { %vm103_vm2 = vcmp.eq.s32.totalorder %v95_v15, %v101_v14 }
  0x90   :  { %v65_v13 = vpop.f32.mrf.mxu0 }
  0x91   :  { %70 = vmax.xlane.f32.xlu0 %v65_v13  ;;  %v104_v18 = vsel %vm102_vm3, %v65_v13, 0.0 }
  0x98   :  { %v67_v16 = vpop.f32.mrf.mxu0 }
  0x99   :  { %72 = vmax.xlane.f32.xlu0 %v67_v16  ;;  %v105_v17 = vsel %vm103_vm2, %v67_v16, 0.0 }
  0x9a   :  { %108 = vadd.xlane.f32.xlu1 %v105_v17 }
  0xa1   :  { %106 = vadd.xlane.f32.xlu0 %v104_v18 }
 0x104   :  { %v71_v19 = vpop.xlane.xlu0 %70 }
 0x105   :  { %v74_v20 = vsub.f32 %v65_v13, %v71_v19 }
 0x107   :  { %v76_v21 = vmul.f32 1.442695, %v74_v20 }
 0x109   :  { %178 = vpow2.f32 %v76_v21 }
 0x10c   :  { %v73_v22 = vpop.xlane.xlu0 %72 }
 0x10d   :  { %v75_v23 = vsub.f32 %v67_v16, %v73_v22  ;;  %v109_v38 = vpop.xlane.xlu1 %108 }
 0x10f   :  { %v179_v24 = vpop.eup %178  ;;  %v78_v25 = vmul.f32 1.442695, %v75_v23 }
 0x110   :  { %80 = vadd.xlane.f32.xlu2 %v179_v24 }
 0x111   :  { %180 = vpow2.f32 %v78_v25 }
 0x114   :  { %v107_v33 = vpop.xlane.xlu0 %106 }
 0x117   :  { %v181_v26 = vpop.eup %180 }
 0x118   :  { %82 = vadd.xlane.f32.xlu2 %v181_v26 }
 0x183   :  { %v81_v27 = vpop.xlane.xlu2 %80 }
 0x184   :  { %182 = vlog2.f32 %v81_v27 }
 0x18a   :  { %v183_v28 = vpop.eup %182 }
 0x18b   :  { %v85_v29 = vmul.f32 0.6931472, %v183_v28  ;;  %v83_v30 = vpop.xlane.xlu2 %82 }
 0x18c   :  { %184 = vlog2.f32 %v83_v30 }
 0x18d   :  { %v88_v31 = vadd.f32 %v85_v29, %v71_v19 }
 0x18f   :  { %v119_v34 = vsub.f32 %v88_v31, %v107_v33 }
 0x191   :  { %v121_v41 = vmul.f32 %v119_v34, %v92_v36 }
 0x192   :  { %v185_v32 = vpop.eup %184 }
 0x193   :  { %v87_v35 = vmul.f32 0.6931472, %v185_v32  ;;  %v126_v43 = vsel %vm125_vm4, %v121_v41, 0.0 }
 0x195   :  { %v89_v37 = vadd.f32 %v87_v35, %v73_v22 }
 0x197   :  { %v120_v40 = vsub.f32 %v89_v37, %v109_v38 }
 0x199   :  { %v122_v42 = vmul.f32 %v120_v40, %v93_v39 }
 0x19b   :  { %v127_v44 = vsel %vm125_vm4, %v122_v42, 0.0 }
 0x19c   :  { %v128_v45 = vadd.f32 %v127_v44, %v126_v43 }
 0x19e   :  { %129 = vadd.xlane.f32.xlu2 %v128_v45 }
 0x211   :  { %v130_v46 = vpop.xlane.xlu2 %129 }
 0x212   :  { %v131_v47 = vrot.slane %v130_v46, 4 }
 0x214   :  { %v132_v48 = vadd.f32 %v131_v47, %v130_v46 }
 0x216   :  { %v133_v49 = vrot.slane %v132_v48, 2 }
 0x218   :  { %v134_v50 = vadd.f32 %v133_v49, %v132_v48 }
 0x21a   :  { %v135_v51 = vrot.slane %v134_v50, 1 }
 0x21c   :  { %v136_v52 = vadd.f32 %v135_v51, %v134_v50 }
 0x21e   :  { %172 = vpush %v136_v52 }
 0x24f   :  { %s173_s6 = spop %172 }
 0x250   :  { %v138_v53 = vstv %s173_s6 }
 0x251   :  { %139 = vst [vmem:[#allocation2] sm:$0x1] %v138_v53 }
 0x252   :  { %150 = dma.vmem_to_hbm [thread:$0]  %s146_s29, 16, %s148_s5, [#allocation3]  }
 0x253   :  { %210 = dma.done.wait [#allocation3], 16  }
 0x254   :  { %211 = vsyncadd [#allocation3], 4294967280 }
 0x255   :  { %155 = vsyncpa [#allocation3], 1 }

</bundles_post_ra>
